<compile_context>
chip_gen: v7x
topology: tpu7x:2x2x1
jax: 0.10.0
libtpu: 0.0.40
codegen_flags: <defaults>
</compile_context>

<pallas_src>
import functools
import math

import jax
import jax.numpy as jnp
from jax.experimental import pallas as pl
from jax.experimental.pallas import tpu as pltpu


def _round_up(v, m):
    return (v + m - 1) // m * m


def _pad2d(a, rows, cols):
    return jnp.pad(a, ((0, rows - a.shape[0]), (0, cols - a.shape[1])))


def _gcn_fused_kernel(x_ref, adj_ref, w1_ref, b1_ref, w2_ref, b2_ref,
                      o_ref, s1_ref, s2_ref, *, compute_dtype):
    phase = pl.program_id(0)
    r = pl.program_id(1)
    tm = o_ref.shape[0]
    row0 = pl.multiple_of(r * tm, tm)

    @pl.when(phase == 0)
    def _():
        # s1[row tile] = x_tile @ W1                                   (MXU)
        s1_ref[pl.ds(row0, tm), :] = jnp.dot(
            x_ref[...].astype(compute_dtype),
            w1_ref[...].astype(compute_dtype),
            preferred_element_type=jnp.float32)

    @pl.when(phase == 1)
    def _():
        # h = relu(adj_tile @ s1 + b1) ; s2[row tile] = h @ W2       (MXU x2)
        h = jnp.dot(adj_ref[...].astype(compute_dtype),
                    s1_ref[...].astype(compute_dtype),
                    preferred_element_type=jnp.float32)
        h = jnp.maximum(h + b1_ref[...], 0.0)
        # TODO(synk): F.dropout(training=True) is stochastic; implemented as
        # identity (inference / eval-mode semantics).
        s2_ref[pl.ds(row0, tm), :] = jnp.dot(
            h.astype(compute_dtype),
            w2_ref[...].astype(compute_dtype),
            preferred_element_type=jnp.float32)

    @pl.when(phase == 2)
    def _():
        # out[row tile] = adj_tile @ s2 + b2                           (MXU)
        out = jnp.dot(adj_ref[...].astype(compute_dtype),
                      s2_ref[...].astype(compute_dtype),
                      preferred_element_type=jnp.float32)
        o_ref[...] = (out + b2_ref[...]).astype(o_ref.dtype)


def gcn_forward(x, adj, w1, b1, w2, b2, *, row_tile=256,
                compute_dtype=jnp.float32):
    """Fused GCN forward:  adj @ relu(adj @ (x @ W1) + b1) @ W2 + b2."""
    n, nfeat = x.shape
    nhid = w1.shape[1]
    nout = w2.shape[1]

    # Lane-dense padding (exact: padded rows/cols are zero and sliced away).
    f_pad = _round_up(nfeat, 128)
    h_pad = _round_up(nhid, 128)
    o_pad = _round_up(nout, 128)
    tm = min(row_tile, _round_up(n, 8))       # row tile, multiple of 8
    n_pad = _round_up(n, tm)
    num_row_tiles = n_pad // tm

    x_p = _pad2d(x.astype(jnp.float32), n_pad, f_pad)
    adj_p = _pad2d(adj.astype(jnp.float32), n_pad, n_pad)
    w1_p = _pad2d(w1.astype(jnp.float32), f_pad, h_pad)
    w2_p = _pad2d(w2.astype(jnp.float32), h_pad, o_pad)
    b1_p = _pad2d(b1.reshape(1, -1).astype(jnp.float32), 1, h_pad)
    b2_p = _pad2d(b2.reshape(1, -1).astype(jnp.float32), 1, o_pad)

    if compute_dtype != jnp.float32:
        # Narrow MXU operands (accumulation stays f32 in-kernel); also halves
        # adj / x HBM + VMEM traffic. Biases stay f32 (added post-accumulate).
        x_p = x_p.astype(compute_dtype)
        adj_p = adj_p.astype(compute_dtype)
        w1_p = w1_p.astype(compute_dtype)
        w2_p = w2_p.astype(compute_dtype)

    in_size = jnp.dtype(compute_dtype).itemsize
    # VMEM budget: double-buffered row slabs + weights + persistent scratch.
    vmem_est = (
        2 * tm * (f_pad + n_pad) * in_size                # x, adj row slabs
        + 2 * (f_pad * h_pad + h_pad * o_pad) * in_size   # W1, W2
        + 2 * (h_pad + o_pad) * 4                         # biases
        + 2 * tm * o_pad * 4                              # out tile
        + n_pad * (h_pad + o_pad) * 4                     # s1, s2 scratch
    )
    # Cap at 64 MiB so the same request is valid on v7x (64 MiB/TC) as well as
    # v5e/v6e (128 MiB/TC).
    vmem_limit = min(64 * 1024 * 1024,
                     max(int(1.5 * vmem_est), 16 * 1024 * 1024))
    # TODO(synk): for N large enough that a (tm, N) adj row slab no longer fits
    # VMEM, add a K-tile over adj columns with a VMEM accumulator.

    flops = 2 * n_pad * (f_pad * h_pad + n_pad * h_pad
                         + h_pad * o_pad + n_pad * o_pad)
    bytes_accessed = (
        x_p.size * in_size
        + 2 * adj_p.size * in_size            # adj read in two phases
        + (w1_p.size + w2_p.size) * in_size
        + (b1_p.size + b2_p.size) * 4
        + n_pad * o_pad * 4)

    kernel = functools.partial(_gcn_fused_kernel, compute_dtype=compute_dtype)

    out_padded = pl.pallas_call(
        kernel,
        out_shape=jax.ShapeDtypeStruct((n_pad, o_pad), jnp.float32),
        grid=(3, num_row_tiles),
        in_specs=[
            pl.BlockSpec((tm, f_pad), lambda p, r: (r, 0)),      # x row slab
            pl.BlockSpec((tm, n_pad), lambda p, r: (r, 0)),      # adj row slab
            pl.BlockSpec((f_pad, h_pad), lambda p, r: (0, 0)),   # W1
            pl.BlockSpec((1, h_pad), lambda p, r: (0, 0)),       # b1
            pl.BlockSpec((h_pad, o_pad), lambda p, r: (0, 0)),   # W2
            pl.BlockSpec((1, o_pad), lambda p, r: (0, 0)),       # b2
        ],
        out_specs=pl.BlockSpec((tm, o_pad), lambda p, r: (r, 0)),
        scratch_shapes=[
            pltpu.VMEM((n_pad, h_pad), jnp.float32),   # s1 = x @ W1
            pltpu.VMEM((n_pad, o_pad), jnp.float32),   # s2 = relu(.) @ W2
        ],
        compiler_params=pltpu.CompilerParams(
            # Both axes "arbitrary": the phase axis is a strict dependency
            # chain and the row axis feeds the shared s1/s2 VMEM scratch, so
            # it cannot be sharded across v7x's two TensorCores.
            dimension_semantics=("arbitrary", "arbitrary"),
            vmem_limit_bytes=vmem_limit,
        ),
        cost_estimate=pl.CostEstimate(
            flops=flops, transcendentals=0, bytes_accessed=bytes_accessed),
    )(x_p, adj_p, w1_p, b1_p, w2_p, b2_p)

    return out_padded[:n, :nout]


def init_gc_params(key, in_features, out_features):
    """Matches GraphConvolution.reset_parameters: U(-stdv, stdv), stdv=1/sqrt(out)."""
    stdv = 1.0 / math.sqrt(out_features)
    k_w, k_b = jax.random.split(key)
    w = jax.random.uniform(
        k_w, (in_features, out_features), jnp.float32, minval=-stdv, maxval=stdv)
    b = jax.random.uniform(
        k_b, (out_features,), jnp.float32, minval=-stdv, maxval=stdv)
    return w, b


if __name__ == "__main__":
    # Small GCN: N nodes with nfeat input features -> nhid -> nout
    N, nfeat, nhid, nout = 64, 32, 32, 16

    key = jax.random.PRNGKey(0)
    k_x, k_adj, k_gc1, k_gc2 = jax.random.split(key, 4)

    x = jax.random.normal(k_x, (N, nfeat), jnp.float32)
    # dense (row-normalized) adjacency standing in for the sparse adj in spmm
    adj_raw = jax.random.uniform(k_adj, (N, N), jnp.float32)
    adj = adj_raw / jnp.sum(adj_raw, axis=1, keepdims=True)

    w1, b1 = init_gc_params(k_gc1, nfeat, nhid)
    w2, b2 = init_gc_params(k_gc2, nhid, nout)

    # f32 path (bit-accurate vs plain-JAX reference)
    out = gcn_forward(x, adj, w1, b1, w2, b2)
    jax.block_until_ready(out)

    ref = jnp.maximum(adj @ (x @ w1) + b1[None, :], 0.0)
    ref = adj @ (ref @ w2) + b2[None, :]
    assert out.shape == (N, nout)
    assert jnp.allclose(out, ref, atol=1e-4, rtol=1e-4), (
        float(jnp.max(jnp.abs(out - ref))))

    # bf16-operand / f32-accumulate path (bf16 MXU fast path on v5e/v6e/v7x)
    out_bf16 = gcn_forward(x, adj, w1, b1, w2, b2, compute_dtype=jnp.bfloat16)
    jax.block_until_ready(out_bf16)
    assert jnp.allclose(out_bf16, ref, atol=5e-2, rtol=5e-2), (
        float(jnp.max(jnp.abs(out_bf16 - ref))))

    print("KERNEL_OK")
</pallas_src>

<mosaic_0001>
module attributes {stable_mosaic.version = 11 : i64} {
  func.func @_gcn_fused_kernel(%arg0: i32, %arg1: i32, %arg2: memref<64x128xf32, #tpu.memory_space<vmem>>, %arg3: memref<64x64xf32, #tpu.memory_space<vmem>>, %arg4: memref<128x128xf32, #tpu.memory_space<vmem>>, %arg5: memref<1x128xf32, #tpu.memory_space<vmem>>, %arg6: memref<128x128xf32, #tpu.memory_space<vmem>>, %arg7: memref<1x128xf32, #tpu.memory_space<vmem>>, %arg8: memref<64x128xf32, #tpu.memory_space<vmem>>, %arg9: memref<64x128xf32, #tpu.memory_space<vmem>>, %arg10: memref<64x128xf32, #tpu.memory_space<vmem>>) attributes {dimension_semantics = [#tpu.dimension_semantics<arbitrary>, #tpu.dimension_semantics<arbitrary>], iteration_bounds = array<i64: 3, 1>, scalar_prefetch = 0 : i64, scratch_operands = 2 : i64, tpu.core_type = #tpu.core_type<tc>, window_params = [{transform_indices = @transform_0, window_bounds = array<i64: 64, 128>}, {transform_indices = @transform_1, window_bounds = array<i64: 64, 64>}, {pipeline_mode = #tpu.pipeline_mode<synchronous>, transform_indices = @transform_2, window_bounds = array<i64: 128, 128>}, {pipeline_mode = #tpu.pipeline_mode<synchronous>, transform_indices = @transform_3, window_bounds = array<i64: 1, 128>}, {pipeline_mode = #tpu.pipeline_mode<synchronous>, transform_indices = @transform_4, window_bounds = array<i64: 128, 128>}, {pipeline_mode = #tpu.pipeline_mode<synchronous>, transform_indices = @transform_5, window_bounds = array<i64: 1, 128>}, {transform_indices = @transform_6, window_bounds = array<i64: 64, 128>}]} {
    %c64_i32 = arith.constant 64 : i32
    %0 = arith.muli %arg1, %c64_i32 : i32
    %1 = tpu.assume_multiple %0, 64 : i32
    %c0_i32 = arith.constant 0 : i32
    %2 = arith.cmpi eq, %arg0, %c0_i32 : i32
    %3 = arith.extui %2 : i1 to i32
    %c0_i32_0 = arith.constant 0 : i32
    %4 = arith.cmpi ne, %3, %c0_i32_0 : i32
    scf.if %4 {
      %c0 = arith.constant 0 : index
      %c0_3 = arith.constant 0 : index
      %11 = vector.load %arg2[%c0, %c0_3] : memref<64x128xf32, #tpu.memory_space<vmem>>, vector<64x128xf32>
      %c0_4 = arith.constant 0 : index
      %c0_5 = arith.constant 0 : index
      %12 = vector.load %arg4[%c0_4, %c0_5] : memref<128x128xf32, #tpu.memory_space<vmem>>, vector<128x128xf32>
      %cst = arith.constant dense<0.000000e+00> : vector<64x128xf32>
      %13 = tpu.matmul %11, %12, %cst {dimension_numbers = #tpu.dot_dimension_numbers<[1], [0], [0], [1], [0, 0, 1, 1], [], []>} : vector<64x128xf32>, vector<128x128xf32>, vector<64x128xf32> -> vector<64x128xf32>
      %14 = arith.index_cast %1 : i32 to index
      %c0_6 = arith.constant 0 : index
      %15 = vector.load %arg9[%14, %c0_6] : memref<64x128xf32, #tpu.memory_space<vmem>>, vector<64x128xf32>
      tpu.vector_store %arg9[%14, %c0_6], %13 {strides = array<i32>} : memref<64x128xf32, #tpu.memory_space<vmem>>, vector<64x128xf32>,
    } else {
    }
    %c1_i32 = arith.constant 1 : i32
    %5 = arith.cmpi eq, %arg0, %c1_i32 : i32
    %6 = arith.extui %5 : i1 to i32
    %c0_i32_1 = arith.constant 0 : i32
    %7 = arith.cmpi ne, %6, %c0_i32_1 : i32
    scf.if %7 {
      %c0 = arith.constant 0 : index
      %c0_3 = arith.constant 0 : index
      %11 = vector.load %arg3[%c0, %c0_3] : memref<64x64xf32, #tpu.memory_space<vmem>>, vector<64x64xf32>
      %c0_4 = arith.constant 0 : index
      %c0_5 = arith.constant 0 : index
      %12 = vector.load %arg9[%c0_4, %c0_5] : memref<64x128xf32, #tpu.memory_space<vmem>>, vector<64x128xf32>
      %cst = arith.constant dense<0.000000e+00> : vector<64x128xf32>
      %13 = tpu.matmul %11, %12, %cst {dimension_numbers = #tpu.dot_dimension_numbers<[1], [0], [0], [1], [0, 0, 1, 1], [], []>} : vector<64x64xf32>, vector<64x128xf32>, vector<64x128xf32> -> vector<64x128xf32>
      %c0_6 = arith.constant 0 : index
      %c0_7 = arith.constant 0 : index
      %14 = vector.load %arg5[%c0_6, %c0_7] : memref<1x128xf32, #tpu.memory_space<vmem>>, vector<1x128xf32>
      %15 = vector.broadcast %14 : vector<1x128xf32> to vector<64x128xf32>
      %16 = arith.addf %13, %15 : vector<64x128xf32>
      %cst_8 = arith.constant 0.000000e+00 : f32
      %17 = vector.broadcast %cst_8 : f32 to vector<64x128xf32>
      %18 = arith.maximumf %16, %17 : vector<64x128xf32>
      %c0_9 = arith.constant 0 : index
      %c0_10 = arith.constant 0 : index
      %19 = vector.load %arg6[%c0_9, %c0_10] : memref<128x128xf32, #tpu.memory_space<vmem>>, vector<128x128xf32>
      %cst_11 = arith.constant dense<0.000000e+00> : vector<64x128xf32>
      %20 = tpu.matmul %18, %19, %cst_11 {dimension_numbers = #tpu.dot_dimension_numbers<[1], [0], [0], [1], [0, 0, 1, 1], [], []>} : vector<64x128xf32>, vector<128x128xf32>, vector<64x128xf32> -> vector<64x128xf32>
      %21 = arith.index_cast %1 : i32 to index
      %c0_12 = arith.constant 0 : index
      %22 = vector.load %arg10[%21, %c0_12] : memref<64x128xf32, #tpu.memory_space<vmem>>, vector<64x128xf32>
      tpu.vector_store %arg10[%21, %c0_12], %20 {strides = array<i32>} : memref<64x128xf32, #tpu.memory_space<vmem>>, vector<64x128xf32>,
    } else {
    }
    %c2_i32 = arith.constant 2 : i32
    %8 = arith.cmpi eq, %arg0, %c2_i32 : i32
    %9 = arith.extui %8 : i1 to i32
    %c0_i32_2 = arith.constant 0 : i32
    %10 = arith.cmpi ne, %9, %c0_i32_2 : i32
    scf.if %10 {
      %c0 = arith.constant 0 : index
      %c0_3 = arith.constant 0 : index
      %11 = vector.load %arg3[%c0, %c0_3] : memref<64x64xf32, #tpu.memory_space<vmem>>, vector<64x64xf32>
      %c0_4 = arith.constant 0 : index
      %c0_5 = arith.constant 0 : index
      %12 = vector.load %arg10[%c0_4, %c0_5] : memref<64x128xf32, #tpu.memory_space<vmem>>, vector<64x128xf32>
      %cst = arith.constant dense<0.000000e+00> : vector<64x128xf32>
      %13 = tpu.matmul %11, %12, %cst {dimension_numbers = #tpu.dot_dimension_numbers<[1], [0], [0], [1], [0, 0, 1, 1], [], []>} : vector<64x64xf32>, vector<64x128xf32>, vector<64x128xf32> -> vector<64x128xf32>
      %c0_6 = arith.constant 0 : index
      %c0_7 = arith.constant 0 : index
      %14 = vector.load %arg7[%c0_6, %c0_7] : memref<1x128xf32, #tpu.memory_space<vmem>>, vector<1x128xf32>
      %15 = vector.broadcast %14 : vector<1x128xf32> to vector<64x128xf32>
      %16 = arith.addf %13, %15 : vector<64x128xf32>
      %c0_8 = arith.constant 0 : index
      %c0_9 = arith.constant 0 : index
      %17 = vector.load %arg8[%c0_8, %c0_9] : memref<64x128xf32, #tpu.memory_space<vmem>>, vector<64x128xf32>
      tpu.vector_store %arg8[%c0_8, %c0_9], %16 {strides = array<i32>} : memref<64x128xf32, #tpu.memory_space<vmem>>, vector<64x128xf32>,
    } else {
    }
    return
  }
  func.func @transform_0(%arg0: i32, %arg1: i32) -> (i32, i32) {
    %c0_i32 = arith.constant 0 : i32
    %c0_i32_0 = arith.constant 0 : i32
    return %arg1, %c0_i32 : i32, i32
  }
  func.func @transform_1(%arg0: i32, %arg1: i32) -> (i32, i32) {
    %c0_i32 = arith.constant 0 : i32
    %c0_i32_0 = arith.constant 0 : i32
    return %arg1, %c0_i32 : i32, i32
  }
  func.func @transform_2(%arg0: i32, %arg1: i32) -> (i32, i32) {
    %c0_i32 = arith.constant 0 : i32
    %c0_i32_0 = arith.constant 0 : i32
    %c0_i32_1 = arith.constant 0 : i32
    return %c0_i32, %c0_i32_0 : i32, i32
  }
  func.func @transform_3(%arg0: i32, %arg1: i32) -> (i32, i32) {
    %c0_i32 = arith.constant 0 : i32
    %c0_i32_0 = arith.constant 0 : i32
    %c0_i32_1 = arith.constant 0 : i32
    return %c0_i32, %c0_i32_0 : i32, i32
  }
  func.func @transform_4(%arg0: i32, %arg1: i32) -> (i32, i32) {
    %c0_i32 = arith.constant 0 : i32
    %c0_i32_0 = arith.constant 0 : i32
    %c0_i32_1 = arith.constant 0 : i32
    return %c0_i32, %c0_i32_0 : i32, i32
  }
  func.func @transform_5(%arg0: i32, %arg1: i32) -> (i32, i32) {
    %c0_i32 = arith.constant 0 : i32
    %c0_i32_0 = arith.constant 0 : i32
    %c0_i32_1 = arith.constant 0 : i32
    return %c0_i32, %c0_i32_0 : i32, i32
  }
  func.func @transform_6(%arg0: i32, %arg1: i32) -> (i32, i32) {
    %c0_i32 = arith.constant 0 : i32
    %c0_i32_0 = arith.constant 0 : i32
    return %arg1, %c0_i32 : i32, i32
  }
}

</mosaic_0001>

<bundles_post_ra>
// kernel: tpu_custom_call.1
= control target key start
LH: loop header
LB: loop body
LE: loop exit
PB: predicated region body
PF: predicated region fallthrough
CT: control target
= control target key end

     0   :  { %11 = vsyncpa [#allocation5], 0  ;;  %s1911_s0 = inlined_call_operand.hbm [shape: f32[64,128], index: 0, kind: input, shape index: {}]   ;;  %s1912_s1 = inlined_call_operand.hbm [shape: f32[64,64], index: 1, kind: input, shape index: {}]   ;;  %s1913_s2 = inlined_call_operand.hbm [shape: f32[128,128], index: 2, kind: input, shape index: {}]   ;;  %s1914_s3 = inlined_call_operand.vmem [shape: f32[1,128], index: 3, kind: input, shape index: {}]   ;;  %s1915_s4 = inlined_call_operand.hbm [shape: f32[128,128], index: 4, kind: input, shape index: {}]   ;;  %s1916_s5 = inlined_call_operand.vmem [shape: f32[1,128], index: 5, kind: input, shape index: {}]   ;;  %s1917_s6 = inlined_call_operand.hbm [shape: f32[64,128], index: 6, kind: output, shape index: {}]  }
   0x1   :  { %12 = vsyncpa [#allocation8], 0 }
   0x2   :  { %13 = vsyncpa [#allocation11], 0 }
   0x3   :  { %14 = vsyncpa [#allocation6], 0  ;;  %s1693_s21 = smov 0   ;;  %s1695_s22 = smov 0  }
   0x4   :  { %s1697_s23 = smov 0  }
   0x5 LB: > { %s1015_s24 = sadd.s32 4294967295, %s1647_s23   ;;  %p1016_p0 = scmp.ge.s32.totalorder %s1647_s23, 1  ;;  %s1647_s23 = sphi %s1697_s23, %s20_s23   ;;  %s1643_s22 = sphi %s1695_s22, %s1930_s22   ;;  %s1639_s21 = sphi %s1693_s21, %s1929_s21  }
   0x6   : > { %p199_p1 = scmp.lt.s32.totalorder %s1647_s23, 4  ;;  %p1713_p2 = scmp.eq.s32.totalorder %s1015_s24, 0 }
   0x7   : > { %s1649_s27 = smov [#allocation7]   ;;  %s32_s30 = sadd.s32 1, %s1643_s22 }
   0x8   : > { %s1921_s25 = scalar_select %p1713_p2, 1, 0 }
   0x9   : > { %p1717_p3 = pnand %p1016_p0, %p199_p1  ;;  %s230_s28 = sshll.u32 %s1649_s27, 4  ;;  %s1721_s28 = int_to_ptr.vmem [resolvable:$true] %s230_s28 }
   0xa   : > { %p1732_p6 = scmp.ge.s32.totalorder %s32_s30, 3  ;;  %s1650_s8 = smov [#allocation4]  }
   0xb   : > { %s1922_s26 = scalar_select %p1717_p3, 1, 0 }
   0xc   : > { %p1415_p4 = pneg %p1717_p3  ;;  %s214_s9 = sshll.u32 %s1650_s8, 4  ;;  %s215_s9 = int_to_ptr.vmem [resolvable:$true] %s214_s9 }
   0xd   : > { %s1471_s12 = scalar_lea.hbm %s1912_s1, 1024 }
   0xe   : > { %p1727_p5 = pnand %p1713_p2, %p1415_p4  ;;  %p1472_p7 = scmp.ne.s32.totalorder %s1912_s1, %s1471_s12 }
   0xf   : > { %p1478_p11 = scmp.lt.u32.totalorder %s1471_s12, %s1912_s1 }
  0x10   : > { %p1744_p8 = pneg %p1727_p5 }
  0x12   : > { %p1474_p9 = pnand %p1744_p8, %p1472_p7 }
  0x14   : > { %p1475_p10 = pneg %p1474_p9 }
  0x16   : > { %p1480_p12 = pnand %p1478_p11, %p1475_p10 }
  0x18   : > { %1483 = shalt.err (!%p1480_p12)
}
  0x19   : > { %s1484_s18 = scalar_lea.vmem %s1721_s28, 1024  ;;  %p1492_p4 = scmp.lt.s32.totalorder %s1721_s28, %s1721_s28 }
  0x1a   : > { %p1485_p13 = scmp.ne.s32.totalorder %s1721_s28, %s1484_s18  ;;  %p1493_p2 = scmp.lt.s32.totalorder %s1484_s18, %s1484_s18 }
  0x1c   : > { %p1487_p0 = pnand %p1485_p13, %p1744_p8  ;;  %p1494_p7 = por %p1493_p2, %p1492_p4 }
  0x1e   : > { %p1488_p1 = pneg %p1487_p0 }
  0x20   : > { %p1495_p9 = pnand %p1494_p7, %p1488_p1 }
  0x22   : > { %1498 = shalt.err (!%p1495_p9)
}
  0x23   : > { %s1651_s19 = smov 128   ;;  %s1652_s20 = smov 8  }
  0x24   : > { %1421 = dma.hbm_to_vmem [thread:$0]  (!%p1727_p5), %s1912_s1, 1024, %s1721_s28, [#allocation8], %s1651_s19, %s1651_s19, %s1652_s20  }
  0x25   : > { %s1932_s30 = smov (%p1732_p6, %s32_s30), 0  ;;  %s1499_s12 = scalar_lea.hbm %s1911_s0, 1024 }
  0x26   : > { %p1500_p2 = scmp.ne.s32.totalorder %s1911_s0, %s1499_s12  ;;  %p1506_p12 = scmp.lt.u32.totalorder %s1499_s12, %s1911_s0 }
  0x28   : > { %p1502_p10 = pnand %p1500_p2, %p1744_p8 }
  0x2a   : > { %p1503_p11 = pneg %p1502_p10 }
  0x2c   : > { %p1508_p13 = pnand %p1506_p12, %p1503_p11 }
  0x2e   : > { %1511 = shalt.err (!%p1508_p13)
}
  0x2f   : > { %s1512_s28 = scalar_lea.vmem %s215_s9, 1024  ;;  %p1520_p4 = scmp.lt.s32.totalorder %s215_s9, %s215_s9 }
  0x30   : > { %p1513_p6 = scmp.ne.s32.totalorder %s215_s9, %s1512_s28  ;;  %p1521_p7 = scmp.lt.s32.totalorder %s1512_s28, %s1512_s28 }
  0x32   : > { %p1515_p0 = pnand %p1513_p6, %p1744_p8  ;;  %p1522_p9 = por %p1521_p7, %p1520_p4 }
  0x34   : > { %p1516_p1 = pneg %p1515_p0 }
  0x36   : > { %p1523_p3 = pnand %p1522_p9, %p1516_p1 }
  0x38   : > { %1526 = shalt.err (!%p1523_p3)
}
  0x39   : > { %1418 = dma.hbm_to_vmem [thread:$0]  (!%p1727_p5), %s1911_s0, 1024, %s215_s9, [#allocation5], %s1651_s19, %s1651_s19, %s1652_s20  }
  0x3a   : > { %s1653_s27 = smov [#allocation9]   ;;  %s1654_s10 = smov [#allocation10]  }
  0x3b   : > { %s243_s8 = sshll.u32 %s1653_s27, 4  ;;  %s259_s11 = sshll.u32 %s1654_s10, 4  ;;  %s244_s8 = int_to_ptr.vmem [resolvable:$true] %s243_s8  ;;  %s260_s11 = int_to_ptr.vmem [resolvable:$true] %s259_s11 }
  0x3c   : > { %s1527_s14 = scalar_lea.hbm %s1913_s2, 2048 }
  0x3d   : > { %p1528_p3 = scmp.ne.s32.totalorder %s1913_s2, %s1527_s14  ;;  %p1534_p11 = scmp.lt.u32.totalorder %s1527_s14, %s1913_s2 }
  0x3f   : > { %p1530_p2 = pnand %p1528_p3, %p1744_p8 }
  0x41   : > { %p1531_p10 = pneg %p1530_p2 }
  0x43   : > { %p1536_p12 = pnand %p1534_p11, %p1531_p10 }
  0x45   : > { %1539 = shalt.err (!%p1536_p12)
}
  0x46   : > { %s1540_s9 = scalar_lea.vmem %s244_s8, 2048  ;;  %p1548_p1 = scmp.lt.s32.totalorder %s244_s8, %s244_s8 }
  0x47   : > { %p1541_p13 = scmp.ne.s32.totalorder %s244_s8, %s1540_s9  ;;  %p1549_p4 = scmp.lt.s32.totalorder %s1540_s9, %s1540_s9 }
  0x49   : > { %p1543_p6 = pnand %p1541_p13, %p1744_p8  ;;  %p1550_p7 = por %p1549_p4, %p1548_p1 }
  0x4b   : > { %p1544_p0 = pneg %p1543_p6 }
  0x4d   : > { %p1551_p9 = pnand %p1550_p7, %p1544_p0 }
  0x4f   : > { %1554 = shalt.err (!%p1551_p9)
}
  0x50   : > { %1424 = dma.hbm_to_vmem [thread:$0]  (!%p1727_p5), %s1913_s2, 2048, %s244_s8, [#allocation8], %s1651_s19, %s1651_s19, %s1652_s20  }
  0x51   : > { %s1555_s13 = scalar_lea.hbm %s1915_s4, 2048 }
  0x52   : > { %p1556_p3 = scmp.ne.s32.totalorder %s1915_s4, %s1555_s13  ;;  %p1562_p11 = scmp.lt.u32.totalorder %s1555_s13, %s1915_s4 }
  0x54   : > { %p1558_p2 = pnand %p1556_p3, %p1744_p8 }
  0x56   : > { %p1559_p10 = pneg %p1558_p2 }
  0x58   : > { %p1564_p12 = pnand %p1562_p11, %p1559_p10 }
  0x5a   : > { %1567 = shalt.err (!%p1564_p12)
}
  0x5b   : > { %s1568_s7 = scalar_lea.vmem %s260_s11, 2048  ;;  %p1576_p1 = scmp.lt.s32.totalorder %s260_s11, %s260_s11 }
  0x5c   : > { %p1569_p13 = scmp.ne.s32.totalorder %s260_s11, %s1568_s7  ;;  %p1577_p4 = scmp.lt.s32.totalorder %s1568_s7, %s1568_s7 }
  0x5e   : > { %p1571_p6 = pnand %p1569_p13, %p1744_p8  ;;  %p1578_p7 = por %p1577_p4, %p1576_p1 }
  0x60   : > { %p1572_p0 = pneg %p1571_p6 }
  0x62   : > { %p1579_p9 = pnand %p1578_p7, %p1572_p0 }
  0x64   : > { %1582 = shalt.err (!%p1579_p9)
}
  0x65   : > { %1427 = dma.hbm_to_vmem [thread:$0]  (!%p1727_p5), %s1915_s4, 2048, %s260_s11, [#allocation11], %s1651_s19, %s1651_s19, %s1652_s20  }
  0x66   : > { %p1926_p3 = scmp.ne.s32.totalorder %s1922_s26, 0 }
  0x67   : > { %p1927_p8 = scmp.ne.s32.totalorder (!%p1926_p3), %s1921_s25, 0 }
  0x68   : > { %278 = sbr.rel (%p1926_p3) target bundleno = 1101 (0x44d), region = 44 }
  0x6f   : > { %1622 = dma.done.wait (%p1927_p8), [#allocation5], 1024  }
  0x70   : > { %1624 = vsyncadd (%p1927_p8), [#allocation5], 4294966272 }
  0x71   : > { %1626 = dma.done.wait (%p1927_p8), [#allocation8], 3072  }
  0x72   : > { %1628 = vsyncadd (%p1927_p8), [#allocation8], 4294964224 }
  0x73   : > { %1630 = dma.done.wait (%p1927_p8), [#allocation11], 2048  }
  0x74   : > { %1632 = vsyncadd (%p1927_p8), [#allocation11], 4294965248  ;;  %p1026_p5 = scmp.ne.s32.totalorder %s1639_s21, 0 }
  0x75   : > { %v326_v0 = vld [vmem:[#allocation9] sm:$0xff] (!%p1026_p5)  ;;  %v327_v1 = vld [vmem:[#allocation9 + $0x8] sm:$0xff] (!%p1026_p5)  ;;  %v328_v2 = vld [vmem:[#allocation9 + $0x10] sm:$0xff] (!%p1026_p5) }
  0x76   : > { %317 = sbr.rel (%p1026_p5) target bundleno = 370 (0x172), region = 64  ;;  %v1275_v3 = vpack.c.bf16 (!%p1026_p5), %v327_v1, %v326_v0  ;;  %v329_v4 = vld [vmem:[#allocation9 + $0x18] sm:$0xff] (!%p1026_p5)  ;;  %v330_v6 = vld [vmem:[#allocation9 + $0x20] sm:$0xff] (!%p1026_p5)  ;;  %v331_v7 = vld [vmem:[#allocation9 + $0x28] sm:$0xff] (!%p1026_p5) }
  0x77   : > { %v1279_v5 = vpack.c.bf16 (!%p1026_p5), %v329_v4, %v328_v2  ;;  %v1283_v8 = vpack.c.bf16 (!%p1026_p5), %v331_v7, %v330_v6  ;;  %v318_v9 = vld [vmem:[#allocation4] sm:$0xff] (!%p1026_p5)  ;;  %v332_v11 = vld [vmem:[#allocation9 + $0x30] sm:$0xff] (!%p1026_p5)  ;;  %v333_v12 = vld [vmem:[#allocation9 + $0x38] sm:$0xff] (!%p1026_p5) }
  0x78   : > { %1276 = vmatprep.subr.bf16.mxu0 (!%p1026_p5), %v1275_v3  ;;  %1371 = vmatprep.subr.bf16.mxu1 (!%p1026_p5), %v1275_v3  ;;  %v322_v10 = vld [vmem:[#allocation4 + $0x20] sm:$0xff] (!%p1026_p5)  ;;  %v1287_v13 = vpack.c.bf16 (!%p1026_p5), %v333_v12, %v332_v11  ;;  %v335_v15 = vld [vmem:[#allocation9 + $0x48] sm:$0xff] (!%p1026_p5)  ;;  %v336_v17 = vld [vmem:[#allocation9 + $0x50] sm:$0xff] (!%p1026_p5) }
  0x79   : > { %1278 = vmatpush3.bf16.msra.mxu0 (!%p1026_p5), %v1275_v3  ;;  %1379 = vmatpush3.bf16.msra.mxu1 (!%p1026_p5), %v1275_v3  ;;  %v334_v14 = vld [vmem:[#allocation9 + $0x40] sm:$0xff] (!%p1026_p5)  ;;  %v337_v18 = vld [vmem:[#allocation9 + $0x58] sm:$0xff] (!%p1026_p5)  ;;  %v339_v21 = vld [vmem:[#allocation9 + $0x68] sm:$0xff] (!%p1026_p5) }
  0x7a   : > { %1280 = vmatprep.subr.bf16.mxu0 (!%p1026_p5), %v1279_v5  ;;  %1372 = vmatprep.subr.bf16.mxu1 (!%p1026_p5), %v1279_v5  ;;  %v1291_v16 = vpack.c.bf16 (!%p1026_p5), %v335_v15, %v334_v14  ;;  %v1295_v19 = vpack.c.bf16 (!%p1026_p5), %v337_v18, %v336_v17  ;;  %v338_v20 = vld [vmem:[#allocation9 + $0x60] sm:$0xff] (!%p1026_p5)  ;;  %v340_v23 = vld [vmem:[#allocation9 + $0x70] sm:$0xff] (!%p1026_p5)  ;;  %v341_v24 = vld [vmem:[#allocation9 + $0x78] sm:$0xff] (!%p1026_p5) }
  0x7b   : > { %1163 = vmatprep.mubr.f32.mxu0 (!%p1026_p5), %v318_v9  ;;  %1169 = vmatprep.mubr.f32.mxu1 (!%p1026_p5), %v322_v10  ;;  %v1299_v22 = vpack.c.bf16 (!%p1026_p5), %v339_v21, %v338_v20  ;;  %v1303_v25 = vpack.c.bf16 (!%p1026_p5), %v341_v24, %v340_v23  ;;  %v319_v26 = vld [vmem:[#allocation4 + $0x8] sm:$0xff] (!%p1026_p5)  ;;  %v320_v28 = vld [vmem:[#allocation4 + $0x10] sm:$0xff] (!%p1026_p5)  ;;  %v321_v30 = vld [vmem:[#allocation4 + $0x18] sm:$0xff] (!%p1026_p5) }
  0x7c   : > { %v323_v27 = vld [vmem:[#allocation4 + $0x28] sm:$0xff] (!%p1026_p5)  ;;  %v324_v29 = vld [vmem:[#allocation4 + $0x30] sm:$0xff] (!%p1026_p5)  ;;  %v325_v31 = vld [vmem:[#allocation4 + $0x38] sm:$0xff] (!%p1026_p5) }
  0x7d   : > { %1282 = vmatpush3.bf16.msra.mxu0 %v1279_v5  ;;  %1380 = vmatpush3.bf16.msra.mxu1 %v1279_v5 }
  0x7e   : > { %1284 = vmatprep.subr.bf16.mxu0 %v1283_v8  ;;  %1373 = vmatprep.subr.bf16.mxu1 %v1283_v8 }
  0x81   : > { %1286 = vmatpush3.bf16.msra.mxu0 %v1283_v8  ;;  %1381 = vmatpush3.bf16.msra.mxu1 %v1283_v8 }
  0x82   : > { %1288 = vmatprep.subr.bf16.mxu0 %v1287_v13  ;;  %1374 = vmatprep.subr.bf16.mxu1 %v1287_v13 }
  0x85   : > { %1290 = vmatpush3.bf16.msra.mxu0 %v1287_v13  ;;  %1382 = vmatpush3.bf16.msra.mxu1 %v1287_v13 }
  0x86   : > { %1292 = vmatprep.subr.bf16.mxu0 %v1291_v16  ;;  %1375 = vmatprep.subr.bf16.mxu1 %v1291_v16 }
  0x89   : > { %1294 = vmatpush3.bf16.msra.mxu0 %v1291_v16  ;;  %1383 = vmatpush3.bf16.msra.mxu1 %v1291_v16 }
  0x8a   : > { %1296 = vmatprep.subr.bf16.mxu0 %v1295_v19  ;;  %1376 = vmatprep.subr.bf16.mxu1 %v1295_v19 }
  0x8d   : > { %1298 = vmatpush3.bf16.msra.mxu0 %v1295_v19  ;;  %1384 = vmatpush3.bf16.msra.mxu1 %v1295_v19 }
  0x8e   : > { %1300 = vmatprep.subr.bf16.mxu0 %v1299_v22  ;;  %1377 = vmatprep.subr.bf16.mxu1 %v1299_v22 }
  0x91   : > { %1302 = vmatpush3.bf16.msra.mxu0 %v1299_v22  ;;  %1385 = vmatpush3.bf16.msra.mxu1 %v1299_v22 }
  0x92   : > { %1304 = vmatprep.subr.bf16.mxu0 %v1303_v25  ;;  %1378 = vmatprep.subr.bf16.mxu1 %v1303_v25 }
  0x95   : > { %1306 = vmatpush3.bf16.msra.mxu0 %v1303_v25  ;;  %1386 = vmatpush3.bf16.msra.mxu1 %v1303_v25 }
  0x98   : > { %1164 = vmatmul.mubr.f32.vlgmr.msra.gmra.mrb[0].mxu0 %v319_v26  ;;  %1170 = vmatmul.mubr.f32.vlgmr.msra.gmra.mrb[0].mxu1 %v323_v27 }
  0x99   : > { %1166 = vmatprep.mubr.f32.mxu0 %v320_v28  ;;  %1172 = vmatprep.mubr.f32.mxu1 %v324_v29 }
  0x9c   : > { %1167 = vmatmul.mubr.f32.gmra.mrb[2].mxu0 %v321_v30  ;;  %1173 = vmatmul.mubr.f32.gmra.mrb[2].mxu1 %v325_v31 }
 0x16b   : > { %v1165_v32 = vpop.f32.mrb[0].mxu0  ;;  %v1171_v33 = vpop.f32.mrb[0].mxu1 }
 0x16c   : > { %449 = vst [vmem:[#allocation2 + $0x8] sm:$0xff] %v1165_v32  ;;  %453 = vst [vmem:[#allocation2 + $0x28] sm:$0xff] %v1171_v33  ;;  %v408_v34 = vpop.f32.mrb[1].mxu0  ;;  %v428_v35 = vpop.f32.mrb[1].mxu1 }
 0x16d   : > { %448 = vst [vmem:[#allocation2] sm:$0xff] %v408_v34  ;;  %452 = vst [vmem:[#allocation2 + $0x20] sm:$0xff] %v428_v35 }
 0x16f   : > { %v1168_v36 = vpop.f32.mrb[2].mxu0  ;;  %v1174_v37 = vpop.f32.mrb[2].mxu1 }
 0x170   : > { %451 = vst [vmem:[#allocation2 + $0x18] sm:$0xff] %v1168_v36  ;;  %455 = vst [vmem:[#allocation2 + $0x38] sm:$0xff] %v1174_v37  ;;  %v418_v38 = vpop.f32.mrb[3].mxu0  ;;  %v438_v39 = vpop.f32.mrb[3].mxu1 }
 0x171   : > { %450 = vst [vmem:[#allocation2 + $0x10] sm:$0xff] %v418_v38  ;;  %454 = vst [vmem:[#allocation2 + $0x30] sm:$0xff] %v438_v39 }
 0x172 PF: > { %p1027_p2 = scmp.ne.s32.totalorder %s1639_s21, 1 }
 0x173   : > { %v469_v41 = vld [vmem:[#allocation2 + $0x8] sm:$0xff] (!%p1027_p2)  ;;  %vm483_vm0 = vcmask (!%p1027_p2), 523264   ;;  %v460_v48 = vld [vmem:[#allocation7] sm:$0xff] (!%p1027_p2)  ;;  %v623_v55 = vld [vmem:[#allocation10 + $0x10] sm:$0xff] (!%p1027_p2) }
 0x174   : > { %459 = sbr.rel (%p1027_p2) target bundleno = 835 (0x343), region = 68  ;;  %v468_v40 = vld [vmem:[#allocation2] sm:$0xff] (!%p1027_p2)  ;;  %v473_v47 = vld [vmem:[#allocation2 + $0x28] sm:$0xff] (!%p1027_p2)  ;;  %1191 = vmatprep.mubr.msk.f32.mxu0 (!%p1027_p2), %vm483_vm0, %v460_v48  ;;  %v624_v56 = vld [vmem:[#allocation10 + $0x18] sm:$0xff] (!%p1027_p2) }
 0x175   : > { %v1307_v43 = vpack.c.bf16 (!%p1027_p2), %v469_v41, %v468_v40  ;;  %v472_v46 = vld [vmem:[#allocation2 + $0x20] sm:$0xff] (!%p1027_p2)  ;;  %v622_v52 = vld [vmem:[#allocation10 + $0x8] sm:$0xff] (!%p1027_p2)  ;;  %v1327_v57 = vpack.c.bf16 (!%p1027_p2), %v624_v56, %v623_v55  ;;  %v627_v62 = vld [vmem:[#allocation10 + $0x30] sm:$0xff] (!%p1027_p2) }
 0x176   : > { %v1315_v49 = vpack.c.bf16 (!%p1027_p2), %v473_v47, %v472_v46  ;;  %v621_v51 = vld [vmem:[#allocation10] sm:$0xff] (!%p1027_p2)  ;;  %v626_v59 = vld [vmem:[#allocation10 + $0x28] sm:$0xff] (!%p1027_p2)  ;;  %v628_v63 = vld [vmem:[#allocation10 + $0x38] sm:$0xff] (!%p1027_p2) }
 0x177   : > { %v471_v44 = vld [vmem:[#allocation2 + $0x18] sm:$0xff] (!%p1027_p2)  ;;  %1308 = vmatprep.subr.bf16.mxu0 (!%p1027_p2), %v1307_v43  ;;  %v1323_v54 = vpack.c.bf16 (!%p1027_p2), %v622_v52, %v621_v51  ;;  %v625_v58 = vld [vmem:[#allocation10 + $0x20] sm:$0xff] (!%p1027_p2)  ;;  %v1335_v0 = vpack.c.bf16 (!%p1027_p2), %v628_v63, %v627_v62  ;;  %v630_v2 = vld [vmem:[#allocation10 + $0x48] sm:$0xff] (!%p1027_p2) }
 0x178   : > { %v470_v42 = vld [vmem:[#allocation2 + $0x10] sm:$0xff] (!%p1027_p2)  ;;  %1310 = vmatpush3.bf16.msra.mxu0 (!%p1027_p2), %v1307_v43  ;;  %v475_v53 = vld [vmem:[#allocation2 + $0x38] sm:$0xff] (!%p1027_p2)  ;;  %v1331_v61 = vpack.c.bf16 (!%p1027_p2), %v626_v59, %v625_v58  ;;  %v629_v1 = vld [vmem:[#allocation10 + $0x40] sm:$0xff] (!%p1027_p2) }
 0x179   : > { %v1311_v45 = vpack.c.bf16 (!%p1027_p2), %v471_v44, %v470_v42  ;;  %v474_v50 = vld [vmem:[#allocation2 + $0x30] sm:$0xff] (!%p1027_p2)  ;;  %1324 = vmatprep.subr.bf16.mxu1 (!%p1027_p2), %v1323_v54  ;;  %v461_v3 = vld [vmem:[#allocation7 + $0x8] sm:$0xff] (!%p1027_p2)  ;;  %v1339_v5 = vpack.c.bf16 (!%p1027_p2), %v630_v2, %v629_v1  ;;  %v632_v7 = vld [vmem:[#allocation10 + $0x58] sm:$0xff] (!%p1027_p2) }
 0x17a   : > { %v1319_v60 = vpack.c.bf16 (!%p1027_p2), %v475_v53, %v474_v50  ;;  %1326 = vmatpush3.bf16.msra.mxu1 (!%p1027_p2), %v1323_v54  ;;  %v462_v4 = vld [vmem:[#allocation7 + $0x10] sm:$0xff] (!%p1027_p2)  ;;  %v463_v8 = vld [vmem:[#allocation7 + $0x18] sm:$0xff] (!%p1027_p2)  ;;  %v464_v9 = vld [vmem:[#allocation7 + $0x20] sm:$0xff] (!%p1027_p2) }
 0x17b   : > { %1312 = vmatprep.subr.bf16.mxu0 %v1311_v45  ;;  %1328 = vmatprep.subr.bf16.mxu1 %v1327_v57  ;;  %v631_v6 = vld [vmem:[#allocation10 + $0x50] sm:$0xff]  ;;  %v633_v11 = vld [vmem:[#allocation10 + $0x60] sm:$0xff]  ;;  %v634_v12 = vld [vmem:[#allocation10 + $0x68] sm:$0xff] }
 0x17c   : > { %1314 = vmatpush3.bf16.msra.mxu0 %v1311_v45  ;;  %v1343_v10 = vpack.c.bf16 %v632_v7, %v631_v6  ;;  %v465_v13 = vld [vmem:[#allocation7 + $0x28] sm:$0xff]  ;;  %v466_v14 = vld [vmem:[#allocation7 + $0x30] sm:$0xff]  ;;  %v1347_v15 = vpack.c.bf16 %v634_v12, %v633_v11  ;;  %v467_v16 = vld [vmem:[#allocation7 + $0x38] sm:$0xff] }
 0x17d   : > { %1316 = vmatprep.subr.bf16.mxu0 %v1315_v49  ;;  %v635_v17 = vld [vmem:[#allocation10 + $0x70] sm:$0xff]  ;;  %v636_v18 = vld [vmem:[#allocation10 + $0x78] sm:$0xff]  ;;  %v1028_v20 = vld [vmem:[%s1914_s3] ss:$0 sm:$0xff] }
 0x17e   : > { %1330 = vmatpush3.bf16.msra.mxu1 %v1327_v57  ;;  %v1351_v19 = vpack.c.bf16 %v636_v18, %v635_v17 }
 0x17f   : > { %1332 = vmatprep.subr.bf16.mxu1 %v1331_v61 }
 0x180   : > { %1318 = vmatpush3.bf16.msra.mxu0 %v1315_v49 }
 0x181   : > { %1320 = vmatprep.subr.bf16.mxu0 %v1319_v60 }
 0x182   : > { %1334 = vmatpush3.bf16.msra.mxu1 %v1331_v61 }
 0x183   : > { %1336 = vmatprep.subr.bf16.mxu1 %v1335_v0 }
 0x184   : > { %1322 = vmatpush3.bf16.msra.mxu0 %v1319_v60 }
 0x186   : > { %1338 = vmatpush3.bf16.msra.mxu1 %v1335_v0 }
 0x187   : > { %1192 = vmatmul.mubr.msk.f32.vlgmr.msra.gmra.mrb[0].mxu0 %vm483_vm0, %v461_v3  ;;  %1340 = vmatprep.subr.bf16.mxu1 %v1339_v5 }
 0x188   : > { %1194 = vmatprep.mubr.msk.f32.mxu0 %vm483_vm0, %v462_v4 }
 0x18a   : > { %1342 = vmatpush3.bf16.msra.mxu1 %v1339_v5 }
 0x18b   : > { %1195 = vmatmul.mubr.msk.f32.gmra.mrb[2].mxu0 %vm483_vm0, %v463_v8  ;;  %1344 = vmatprep.subr.bf16.mxu1 %v1343_v10 }
 0x18c   : > { %1197 = vmatprep.mubr.msk.f32.mxu0 %vm483_vm0, %v464_v9 }
 0x18e   : > { %1346 = vmatpush3.bf16.msra.mxu1 %v1343_v10 }
 0x18f   : > { %1198 = vmatmul.mubr.msk.f32.gmra.mrb[4].mxu0 %vm483_vm0, %v465_v13  ;;  %1348 = vmatprep.subr.bf16.mxu1 %v1347_v15 }
 0x190   : > { %1200 = vmatprep.mubr.msk.f32.mxu0 %vm483_vm0, %v466_v14 }
 0x192   : > { %1350 = vmatpush3.bf16.msra.mxu1 %v1347_v15 }
 0x193   : > { %1201 = vmatmul.mubr.msk.f32.gmra.mrb[6].mxu0 %vm483_vm0, %v467_v16  ;;  %1352 = vmatprep.subr.bf16.mxu1 %v1351_v19 }
 0x196   : > { %1354 = vmatpush3.bf16.msra.mxu1 %v1351_v19 }
 0x25a   : > { %v1193_v21 = vpop.f32.mrb[0].mxu0 }
 0x25b   : > { %v580_v22 = vadd.f32 %v1193_v21, %v1028_v20  ;;  %v574_v23 = vpop.f32.mrb[1].mxu0 }
 0x25c   : > { %v575_v24 = vadd.f32 %v1028_v20, %v574_v23 }
 0x25d   : > { %v614_v27 = vmax.f32 %v580_v22, 0.0 }
 0x25e   : > { %v1196_v25 = vpop.f32.mrb[2].mxu0  ;;  %v613_v26 = vmax.f32 %v575_v24, 0.0 }
 0x25f   : > { %v590_v28 = vadd.f32 %v1196_v25, %v1028_v20  ;;  %v584_v29 = vpop.f32.mrb[3].mxu0 }
 0x260   : > { %v585_v30 = vadd.f32 %v1028_v20, %v584_v29  ;;  %1235 = vmatprep.mubr.f32.mxu1 %v613_v26 }
 0x261   : > { %1236 = vmatmul.mubr.f32.vlgmr.msra.gmra.mrb[0].mxu1 %v614_v27  ;;  %v616_v33 = vmax.f32 %v590_v28, 0.0 }
 0x262   : > { %v615_v31 = vmax.f32 %v585_v30, 0.0  ;;  %v1199_v32 = vpop.f32.mrb[4].mxu0 }
 0x263   : > { %v600_v34 = vadd.f32 %v1199_v32, %v1028_v20  ;;  %v594_v35 = vpop.f32.mrb[5].mxu0 }
 0x264   : > { %v595_v36 = vadd.f32 %v1028_v20, %v594_v35  ;;  %1238 = vmatprep.mubr.f32.mxu1 %v615_v31 }
 0x265   : > { %1239 = vmatmul.mubr.f32.gmra.mrb[2].mxu1 %v616_v33  ;;  %v618_v39 = vmax.f32 %v600_v34, 0.0 }
 0x266   : > { %v617_v37 = vmax.f32 %v595_v36, 0.0  ;;  %v1202_v38 = vpop.f32.mrb[6].mxu0 }
 0x267   : > { %v610_v40 = vadd.f32 %v1202_v38, %v1028_v20  ;;  %v604_v41 = vpop.f32.mrb[7].mxu0 }
 0x268   : > { %v605_v42 = vadd.f32 %v1028_v20, %v604_v41  ;;  %1241 = vmatprep.mubr.f32.mxu1 %v617_v37 }
 0x269   : > { %1242 = vmatmul.mubr.f32.gmra.mrb[4].mxu1 %v618_v39  ;;  %v620_v44 = vmax.f32 %v610_v40, 0.0 }
 0x26a   : > { %v619_v43 = vmax.f32 %v605_v42, 0.0 }
 0x26c   : > { %1244 = vmatprep.mubr.f32.mxu1 %v619_v43 }
 0x26d   : > { %1245 = vmatmul.mubr.f32.gmra.mrb[6].mxu1 %v620_v44 }
 0x334   : > { %v1237_v45 = vpop.f32.mrb[0].mxu1 }
 0x335   : > { %744 = vst [vmem:[#allocation3 + $0x8] sm:$0xff] %v1237_v45  ;;  %v703_v46 = vpop.f32.mrb[1].mxu1 }
 0x336   : > { %743 = vst [vmem:[#allocation3] sm:$0xff] %v703_v46 }
 0x338   : > { %v1240_v47 = vpop.f32.mrb[2].mxu1 }
 0x339   : > { %746 = vst [vmem:[#allocation3 + $0x18] sm:$0xff] %v1240_v47  ;;  %v713_v48 = vpop.f32.mrb[3].mxu1 }
 0x33a   : > { %745 = vst [vmem:[#allocation3 + $0x10] sm:$0xff] %v713_v48 }
 0x33c   : > { %v1243_v49 = vpop.f32.mrb[4].mxu1 }
 0x33d   : > { %748 = vst [vmem:[#allocation3 + $0x28] sm:$0xff] %v1243_v49  ;;  %v723_v50 = vpop.f32.mrb[5].mxu1 }
 0x33e   : > { %747 = vst [vmem:[#allocation3 + $0x20] sm:$0xff] %v723_v50 }
 0x340   : > { %v1246_v51 = vpop.f32.mrb[6].mxu1 }
 0x341   : > { %750 = vst [vmem:[#allocation3 + $0x38] sm:$0xff] %v1246_v51  ;;  %v733_v52 = vpop.f32.mrb[7].mxu1 }
 0x342   : > { %749 = vst [vmem:[#allocation3 + $0x30] sm:$0xff] %v733_v52 }
 0x343 PF: > { %p1037_p10 = scmp.ne.s32.totalorder %s1639_s21, 2 }
 0x344   : > { %v763_v53 = vld [vmem:[#allocation3] sm:$0xff] (!%p1037_p10)  ;;  %v764_v54 = vld [vmem:[#allocation3 + $0x8] sm:$0xff] (!%p1037_p10)  ;;  %v765_v55 = vld [vmem:[#allocation3 + $0x10] sm:$0xff] (!%p1037_p10)  ;;  %vm778_vm1 = vcmask (!%p1037_p10), 523264  }
 0x345   : > { %754 = sbr.rel (%p1037_p10) target bundleno = 1075 (0x433), region = 72  ;;  %v1355_v56 = vpack.c.bf16 (!%p1037_p10), %v764_v54, %v763_v53  ;;  %v766_v57 = vld [vmem:[#allocation3 + $0x18] sm:$0xff] (!%p1037_p10)  ;;  %v767_v59 = vld [vmem:[#allocation3 + $0x20] sm:$0xff] (!%p1037_p10)  ;;  %v768_v60 = vld [vmem:[#allocation3 + $0x28] sm:$0xff] (!%p1037_p10) }
 0x346   : > { %v1359_v58 = vpack.c.bf16 (!%p1037_p10), %v766_v57, %v765_v55  ;;  %v755_v61 = vld [vmem:[#allocation7] sm:$0xff] (!%p1037_p10)  ;;  %v1363_v63 = vpack.c.bf16 (!%p1037_p10), %v768_v60, %v767_v59  ;;  %v756_v3 = vld [vmem:[#allocation7 + $0x8] sm:$0xff] (!%p1037_p10)  ;;  %v757_v5 = vld [vmem:[#allocation7 + $0x10] sm:$0xff] (!%p1037_p10) }
 0x347   : > { %1356 = vmatprep.subr.bf16.mxu0 (!%p1037_p10), %v1355_v56  ;;  %1387 = vmatprep.subr.bf16.mxu1 (!%p1037_p10), %v1355_v56  ;;  %v759_v62 = vld [vmem:[#allocation7 + $0x20] sm:$0xff] (!%p1037_p10)  ;;  %v760_v4 = vld [vmem:[#allocation7 + $0x28] sm:$0xff] (!%p1037_p10)  ;;  %v761_v6 = vld [vmem:[#allocation7 + $0x30] sm:$0xff] (!%p1037_p10) }
 0x348   : > { %1358 = vmatpush3.bf16.msra.mxu0 (!%p1037_p10), %v1355_v56  ;;  %1391 = vmatpush3.bf16.msra.mxu1 (!%p1037_p10), %v1355_v56  ;;  %v770_v1 = vld [vmem:[#allocation3 + $0x38] sm:$0xff] (!%p1037_p10)  ;;  %v1038_v9 = vld [vmem:[%s1916_s5] ss:$0 sm:$0xff] (!%p1037_p10) }
 0x349   : > { %1360 = vmatprep.subr.bf16.mxu0 (!%p1037_p10), %v1359_v58  ;;  %1388 = vmatprep.subr.bf16.mxu1 (!%p1037_p10), %v1359_v58  ;;  %v769_v0 = vld [vmem:[#allocation3 + $0x30] sm:$0xff] (!%p1037_p10)  ;;  %v758_v7 = vld [vmem:[#allocation7 + $0x18] sm:$0xff] (!%p1037_p10) }
 0x34a   : > { %1263 = vmatprep.mubr.msk.f32.mxu0 (!%p1037_p10), %vm778_vm1, %v755_v61  ;;  %1269 = vmatprep.mubr.msk.f32.mxu1 (!%p1037_p10), %vm778_vm1, %v759_v62  ;;  %v1367_v2 = vpack.c.bf16 (!%p1037_p10), %v770_v1, %v769_v0  ;;  %v762_v8 = vld [vmem:[#allocation7 + $0x38] sm:$0xff] (!%p1037_p10) }
 0x34c   : > { %1362 = vmatpush3.bf16.msra.mxu0 %v1359_v58  ;;  %1392 = vmatpush3.bf16.msra.mxu1 %v1359_v58 }
 0x34d   : > { %1364 = vmatprep.subr.bf16.mxu0 %v1363_v63  ;;  %1389 = vmatprep.subr.bf16.mxu1 %v1363_v63 }
 0x350   : > { %1366 = vmatpush3.bf16.msra.mxu0 %v1363_v63  ;;  %1393 = vmatpush3.bf16.msra.mxu1 %v1363_v63 }
 0x351   : > { %1368 = vmatprep.subr.bf16.mxu0 %v1367_v2  ;;  %1390 = vmatprep.subr.bf16.mxu1 %v1367_v2 }
 0x354   : > { %1370 = vmatpush3.bf16.msra.mxu0 %v1367_v2  ;;  %1394 = vmatpush3.bf16.msra.mxu1 %v1367_v2 }
 0x357   : > { %1264 = vmatmul.mubr.msk.f32.vlgmr.msra.gmra.mrb[0].mxu0 %vm778_vm1, %v756_v3  ;;  %1270 = vmatmul.mubr.msk.f32.vlgmr.msra.gmra.mrb[0].mxu1 %vm778_vm1, %v760_v4 }
 0x358   : > { %1266 = vmatprep.mubr.msk.f32.mxu0 %vm778_vm1, %v757_v5  ;;  %1272 = vmatprep.mubr.msk.f32.mxu1 %vm778_vm1, %v761_v6 }
 0x35b   : > { %1267 = vmatmul.mubr.msk.f32.gmra.mrb[2].mxu0 %vm778_vm1, %v758_v7  ;;  %1273 = vmatmul.mubr.msk.f32.gmra.mrb[2].mxu1 %vm778_vm1, %v762_v8 }
 0x42a   : > { %v1265_v10 = vpop.f32.mrb[0].mxu0  ;;  %v1271_v11 = vpop.f32.mrb[0].mxu1 }
 0x42b   : > { %v875_v12 = vadd.f32 %v1265_v10, %v1038_v9  ;;  %v895_v13 = vadd.f32 %v1271_v11, %v1038_v9  ;;  %v869_v14 = vpop.f32.mrb[1].mxu0  ;;  %v889_v15 = vpop.f32.mrb[1].mxu1 }
 0x42c   : > { %v870_v16 = vadd.f32 %v1038_v9, %v869_v14  ;;  %v890_v17 = vadd.f32 %v1038_v9, %v889_v15 }
 0x42d   : > { %909 = vst [vmem:[#allocation12 + $0x8] sm:$0xff] %v875_v12  ;;  %913 = vst [vmem:[#allocation12 + $0x28] sm:$0xff] %v895_v13 }
 0x42e   : > { %908 = vst [vmem:[#allocation12] sm:$0xff] %v870_v16  ;;  %912 = vst [vmem:[#allocation12 + $0x20] sm:$0xff] %v890_v17  ;;  %v1268_v18 = vpop.f32.mrb[2].mxu0  ;;  %v1274_v19 = vpop.f32.mrb[2].mxu1 }
 0x42f   : > { %v885_v20 = vadd.f32 %v1268_v18, %v1038_v9  ;;  %v905_v21 = vadd.f32 %v1274_v19, %v1038_v9  ;;  %v879_v22 = vpop.f32.mrb[3].mxu0  ;;  %v899_v23 = vpop.f32.mrb[3].mxu1 }
 0x430   : > { %v880_v24 = vadd.f32 %v1038_v9, %v879_v22  ;;  %v900_v25 = vadd.f32 %v1038_v9, %v899_v23 }
 0x431   : > { %911 = vst [vmem:[#allocation12 + $0x18] sm:$0xff] %v885_v20  ;;  %915 = vst [vmem:[#allocation12 + $0x38] sm:$0xff] %v905_v21 }
 0x432   : > { %910 = vst [vmem:[#allocation12 + $0x10] sm:$0xff] %v880_v24  ;;  %914 = vst [vmem:[#allocation12 + $0x30] sm:$0xff] %v900_v25 }
 0x433 PF: > { %p1876_p11 = scmp.eq.s32.totalorder %s1015_s24, 2  ;;  %s1655_s19 = smov [#allocation12]  }
 0x434   : > { %s925_s20 = sshll.u32 %s1655_s19, 4  ;;  %s926_s20 = int_to_ptr.vmem [resolvable:$true] %s925_s20 }
 0x435   : > { %s1583_s11 = scalar_lea.vmem %s926_s20, 1024  ;;  %p1590_p0 = scmp.lt.s32.totalorder %s926_s20, %s926_s20 }
 0x436   : > { %p1584_p12 = scmp.ne.s32.totalorder %s926_s20, %s1583_s11  ;;  %p1591_p1 = scmp.lt.s32.totalorder %s1583_s11, %s1583_s11 }
 0x438   : > { %p1585_p13 = pnand %p1584_p12, %p1876_p11  ;;  %p1592_p4 = por %p1591_p1, %p1590_p0 }
 0x43a   : > { %p1586_p6 = pneg %p1585_p13 }
 0x43c   : > { %p1593_p7 = pnand %p1592_p4, %p1586_p6 }
 0x43e   : > { %1596 = shalt.err (!%p1593_p7)
}
 0x43f   : > { %s1597_s24 = scalar_lea.hbm %s1917_s6, 1024 }
 0x440   : > { %p1598_p9 = scmp.ne.s32.totalorder %s1917_s6, %s1597_s24  ;;  %p1603_p5 = scmp.lt.u32.totalorder %s1597_s24, %s1917_s6 }
 0x442   : > { %p1599_p3 = pnand %p1598_p9, %p1876_p11 }
 0x444   : > { %p1600_p8 = pneg %p1599_p3 }
 0x446   : > { %p1605_p2 = pnand %p1603_p5, %p1600_p8 }
 0x448   : > { %1608 = shalt.err (!%p1605_p2)
}
 0x449   : > { %s1656_s16 = smov 128   ;;  %s1657_s17 = smov 8  }
 0x44a   : > { %1412 = dma.vmem_to_hbm [thread:$0]  (%p1876_p11), %s926_s20, 1024, %s1917_s6, [#allocation6], %s1656_s16, %s1656_s16, %s1657_s17  }
 0x44b   : > { %1634 = dma.done.wait (%p1876_p11), [#allocation6], 1024  }
 0x44c   : > { %1636 = vsyncadd (%p1876_p11), [#allocation6], 4294966272 }
 0x44d PF: > { %s20_s23 = sadd.s32 1, %s1647_s23   ;;  %s1929_s21 = smov %s1643_s22 }
 0x44e   : > { %p17_p10 = scmp.ge.s32.totalorder %s20_s23, 5   ;;  %s1930_s22 = smov %s1932_s30 }
 0x450   :  { %19 = sbr.rel (!%p17_p10) target bundleno = 5 (0x5), region = 102 }
 0x457   :  { %941 = vsyncpa [#allocation5], 1 }
 0x458   :  { %943 = vsyncpa [#allocation5 + $0x1], 1 }
 0x459   :  { %944 = vsyncpa [#allocation8], 1 }
 0x45a   :  { %945 = vsyncpa [#allocation11], 1 }
 0x45b   :  { %946 = vsyncpa [#allocation6], 1 }
 0x45c   :  { %948 = vsyncpa [#allocation6 + $0x1], 1 }

</bundles_post_ra>
